<compile_context>
chip_gen: v7x
topology: tpu7x:2x2x1
jax: 0.10.0
libtpu: 0.0.40
codegen_flags: <defaults>
</compile_context>

<pallas_src>
import functools
import math

import jax
import jax.numpy as jnp
from jax.experimental import pallas as pl
from jax.experimental.pallas import tpu as pltpu


_LANE = 128
_SUBLANE = 8
# Per-stream block budget: big enough to amortize the ~0.35 us/grid-step
# overhead (hundreds of rows x >=128 lanes), small enough that the
# double-buffered x / bits / out streams plus the resident pe tile stay well
# under the default scoped-VMEM limit on every generation (v5e/v6e/v7x).
_MAX_BLOCK_BYTES = 2 << 20


# ---------------------------------------------------------------------------
# Kernels
# ---------------------------------------------------------------------------
def _add_pe_kernel(x_ref, pe_ref, o_ref):
    """Eval-mode forward: out = x + pe (dropout is identity)."""
    # x_ref: (bt, ct), pe_ref: (1, ct) -> broadcast add over rows.
    o_ref[...] = (x_ref[...] + pe_ref[...]).astype(o_ref.dtype)


def _add_pe_dropout_kernel(x_ref, pe_ref, bits_ref, o_ref, *, threshold, scale):
    """Train-mode forward: out = dropout(x + pe, p).

    bits_ref holds 31 uniform random bits per element (int32 in [0, 2^31)).
    keep  <=> bits >= round(p * 2^31)  (keep probability = 1 - p)
    kept values are scaled by 1 / (1 - p); dropped values are 0.
    """
    y = x_ref[...] + pe_ref[...]
    keep = bits_ref[...] >= jnp.int32(threshold)
    zero = jnp.zeros((), dtype=y.dtype)
    o_ref[...] = jnp.where(keep, y * jnp.asarray(scale, y.dtype), zero).astype(o_ref.dtype)


# ---------------------------------------------------------------------------
# Parameter setup (matches PyTorch __init__ for pos_type='pos-angular')
# ---------------------------------------------------------------------------
def make_pos_angular_pe(n_embd, n_positions, dtype=jnp.float32):
    position = jnp.arange(n_positions, dtype=jnp.float32)[:, None]          # (P, 1)
    div_term = jnp.exp(
        jnp.arange(0, n_embd, 2, dtype=jnp.float32) * (-math.log(10000.0) / n_embd)
    )                                                                        # (D/2,)
    args = position * div_term                                               # (P, D/2)
    pe = jnp.zeros((n_positions, n_embd), dtype=jnp.float32)
    pe = pe.at[:, 0::2].set(jnp.sin(args))
    pe = pe.at[:, 1::2].set(jnp.cos(args))
    return pe.astype(dtype)


# ---------------------------------------------------------------------------
# Tiling helper
# ---------------------------------------------------------------------------
def _choose_block(n_rows, n_cols, itemsize):
    """Pick a (row, col) block: lane-dense, divides the array, fits the budget."""
    # Column (lane) tile: multiple of 128 that divides n_cols, else full extent.
    if n_cols % _LANE == 0:
        max_ct = max(_LANE, (_MAX_BLOCK_BYTES // (_SUBLANE * itemsize)) // _LANE * _LANE)
        ct = min(n_cols, max_ct)
        while n_cols % ct != 0:
            ct -= _LANE
    else:
        ct = n_cols
    # Row (sublane) tile: multiple of 8 that divides n_rows, else full extent.
    row_bytes = ct * itemsize
    if n_rows % _SUBLANE == 0:
        max_bt = max(_SUBLANE, (_MAX_BLOCK_BYTES // max(row_bytes, 1)) // _SUBLANE * _SUBLANE)
        bt = min(n_rows, max_bt)
        while n_rows % bt != 0:
            bt -= _SUBLANE
    else:
        bt = n_rows
    return bt, ct


# ---------------------------------------------------------------------------
# Wrapper
# ---------------------------------------------------------------------------
def positional_encoding_forward(x, pe, *, dropout_p=0.1, training=False, rng_key=None):
    """Equivalent of PositionalEncoding(pos_type='pos-angular').forward(x)."""
    B, L, D = x.shape
    pe_l = pe[:L].astype(x.dtype)          # pe[:x.shape[1]], matched dtype

    # Lane-dense 2-D view: (B, L*D). pe broadcasts over the batch rows.
    R, C = B, L * D
    x2 = x.reshape(R, C)
    pe2 = pe_l.reshape(1, C)

    bt, ct = _choose_block(R, C, jnp.dtype(x.dtype).itemsize)
    grid = (R // bt, C // ct)
    x_spec = pl.BlockSpec((bt, ct), lambda i, j: (i, j))
    pe_spec = pl.BlockSpec((1, ct), lambda i, j: (0, j))
    out_spec = pl.BlockSpec((bt, ct), lambda i, j: (i, j))
    cparams = pltpu.CompilerParams(dimension_semantics=("parallel", "parallel"))

    if training and dropout_p > 0.0:
        if rng_key is None:
            rng_key = jax.random.PRNGKey(0)
        # 31 uniform random bits per element; generated with the standard JAX
        # PRNG (portable) and streamed into the kernel as an int32 plane.
        bits = (jax.random.bits(rng_key, (R, C), dtype=jnp.uint32) >> 1).astype(jnp.int32)
        threshold = int(round(float(dropout_p) * (1 << 31)))
        scale = 1.0 / (1.0 - float(dropout_p))
        kernel = functools.partial(_add_pe_dropout_kernel, threshold=threshold, scale=scale)
        out2 = pl.pallas_call(
            kernel,
            out_shape=jax.ShapeDtypeStruct((R, C), x.dtype),
            grid=grid,
            in_specs=[x_spec, pe_spec, x_spec],
            out_specs=out_spec,
            compiler_params=cparams,
        )(x2, pe2, bits)
    else:
        out2 = pl.pallas_call(
            _add_pe_kernel,
            out_shape=jax.ShapeDtypeStruct((R, C), x.dtype),
            grid=grid,
            in_specs=[x_spec, pe_spec],
            out_specs=out_spec,
            compiler_params=cparams,
        )(x2, pe2)

    return out2.reshape(B, L, D)


# TODO(synk): the rest of SimpleTransformer (input Linear projection and the
# n_layer TransformerEncoder stack) is not implemented here; this kernel covers
# the PositionalEncoding ('pos-angular') + dropout hot path only.


# ---------------------------------------------------------------------------
# Main
# ---------------------------------------------------------------------------
if __name__ == "__main__":
    # Small shapes consistent with the module: n_embd=32, n_positions=16,
    # input x of shape (batch=2, seq=8, n_embd=32).
    n_embd = 32
    n_positions = 16
    B, L = 2, 8

    key = jax.random.PRNGKey(0)
    k_x, k_drop = jax.random.split(key)
    x = jax.random.normal(k_x, (B, L, n_embd), dtype=jnp.float32)
    pe = make_pos_angular_pe(n_embd, n_positions)
    ref = x + pe[:L][None]

    # Eval-mode pass (dropout == identity): verify against pure-JAX reference.
    out_eval = jax.block_until_ready(
        positional_encoding_forward(x, pe, dropout_p=0.1, training=False)
    )
    assert out_eval.shape == (B, L, n_embd)
    assert jnp.allclose(out_eval, ref, atol=1e-6), "eval-mode mismatch"

    # Train-mode pass (keep-mask + 1/(1-p) scaling fused inside the kernel).
    # Semantics match nn.Dropout (not PyTorch's RNG bit-for-bit).
    p = 0.1
    out_train = jax.block_until_ready(
        positional_encoding_forward(x, pe, dropout_p=p, training=True, rng_key=k_drop)
    )
    assert out_train.shape == (B, L, n_embd)
    scaled_ref = ref * (1.0 / (1.0 - p))
    recon = jnp.where(out_train != 0, out_train, scaled_ref)
    assert jnp.allclose(recon, scaled_ref, atol=1e-5), "train-mode kept values mismatch"

    print("KERNEL_OK")
</pallas_src>

<mosaic_0001>
module attributes {stable_mosaic.version = 11 : i64} {
  func.func @_add_pe_kernel(%arg0: i32, %arg1: i32, %arg2: memref<2x256xf32, #tpu.memory_space<vmem>>, %arg3: memref<1x256xf32, #tpu.memory_space<vmem>>, %arg4: memref<2x256xf32, #tpu.memory_space<vmem>>) attributes {dimension_semantics = [#tpu.dimension_semantics<parallel>, #tpu.dimension_semantics<parallel>], iteration_bounds = array<i64: 1, 1>, scalar_prefetch = 0 : i64, scratch_operands = 0 : i64, tpu.core_type = #tpu.core_type<tc>, window_params = [{transform_indices = @transform_0, window_bounds = array<i64: 2, 256>}, {transform_indices = @transform_1, window_bounds = array<i64: 1, 256>}, {transform_indices = @transform_2, window_bounds = array<i64: 2, 256>}]} {
    %c0 = arith.constant 0 : index
    %c0_0 = arith.constant 0 : index
    %0 = vector.load %arg2[%c0, %c0_0] : memref<2x256xf32, #tpu.memory_space<vmem>>, vector<2x256xf32>
    %c0_1 = arith.constant 0 : index
    %c0_2 = arith.constant 0 : index
    %1 = vector.load %arg3[%c0_1, %c0_2] : memref<1x256xf32, #tpu.memory_space<vmem>>, vector<1x256xf32>
    %2 = vector.broadcast %1 : vector<1x256xf32> to vector<2x256xf32>
    %3 = arith.addf %0, %2 : vector<2x256xf32>
    %c0_3 = arith.constant 0 : index
    %c0_4 = arith.constant 0 : index
    %4 = vector.load %arg4[%c0_3, %c0_4] : memref<2x256xf32, #tpu.memory_space<vmem>>, vector<2x256xf32>
    tpu.vector_store %arg4[%c0_3, %c0_4], %3 {strides = array<i32>} : memref<2x256xf32, #tpu.memory_space<vmem>>, vector<2x256xf32>,
    return
  }
  func.func @transform_0(%arg0: i32, %arg1: i32) -> (i32, i32) {
    %c0_i32 = arith.constant 0 : i32
    return %arg0, %arg1 : i32, i32
  }
  func.func @transform_1(%arg0: i32, %arg1: i32) -> (i32, i32) {
    %c0_i32 = arith.constant 0 : i32
    %c0_i32_0 = arith.constant 0 : i32
    return %c0_i32, %arg1 : i32, i32
  }
  func.func @transform_2(%arg0: i32, %arg1: i32) -> (i32, i32) {
    %c0_i32 = arith.constant 0 : i32
    return %arg0, %arg1 : i32, i32
  }
}

</mosaic_0001>

<bundles_post_ra>
// kernel: tpu_custom_call.1
= control target key start
LH: loop header
LB: loop body
LE: loop exit
PB: predicated region body
PF: predicated region fallthrough
CT: control target
= control target key end

     0   :  { %7 = vsyncpa [#allocation3], 0  ;;  %s157_s0 = inlined_call_operand.hbm [shape: f32[2,256], index: 0, kind: input, shape index: {}]   ;;  %s158_s1 = inlined_call_operand.vmem [shape: f32[1,256], index: 1, kind: input, shape index: {}]   ;;  %s159_s2 = inlined_call_operand.hbm [shape: f32[2,256], index: 2, kind: output, shape index: {}]  }
   0x1   :  { %8 = vsyncpa [#allocation4], 0  ;;  %s112_s9 = smov [#allocation2]   ;;  %s64_s13 = scalar_lea.hbm %s157_s0, 64 }
   0x2   :  { %s15_s10 = sshll.u32 %s112_s9, 4  ;;  %p65_p0 = scmp.ne.s32.totalorder %s157_s0, %s64_s13  ;;  %s16_s10 = int_to_ptr.vmem [resolvable:$true] %s15_s10 }
   0x3   :  { %p68_p1 = scmp.lt.u32.totalorder %s64_s13, %s157_s0 }
   0x5   :  { %p70_p2 = pnand %p68_p1, %p65_p0 }
   0x7   :  { %73 = shalt.err (!%p70_p2)
}
   0x8   :  { %s74_s18 = scalar_lea.vmem %s16_s10, 64  ;;  %p79_p4 = scmp.lt.s32.totalorder %s16_s10, %s16_s10 }
   0x9   :  { %p75_p3 = scmp.ne.s32.totalorder %s16_s10, %s74_s18  ;;  %p80_p5 = scmp.lt.s32.totalorder %s74_s18, %s74_s18 }
   0xb   :  { %p81_p6 = por %p80_p5, %p79_p4 }
   0xd   :  { %p82_p7 = pnand %p81_p6, %p75_p3 }
   0xf   :  { %85 = shalt.err (!%p82_p7)
}
  0x10   :  { %18 = dma.hbm_to_vmem [thread:$0]  %s157_s0, 64, %s16_s10, [#allocation3]  }
  0x11   :  { %108 = dma.done.wait [#allocation3], 64  }
  0x12   :  { %109 = vsyncadd [#allocation3], 4294967232  ;;  %v27_v0 = vlaneseq  ;;  %v113_v1 = vmov 1983009808   ;;  %v25_v7 = vld [vmem:[%s158_s1] sm:$0x3] }
  0x13   :  { %v37_v2 = vunpack.c.l.s4 %v113_v1  ;;  %v24_v12 = vld [vmem:[#allocation2] sm:$0xf]  ;;  %s114_s23 = smov [#allocation5]  }
  0x14   :  { %v28_v3 = vshrl.u32 %v27_v0, 7  ;;  %s52_s0 = sshll.u32 %s114_s23, 4  ;;  %s53_s0 = int_to_ptr.vmem [resolvable:$true] %s52_s0 }
  0x15   :  { %v38_v6 = vunpack.c.0.s8 %v37_v2  ;;  %s86_s24 = scalar_lea.vmem %s53_s0, 64  ;;  %p91_p9 = scmp.lt.s32.totalorder %s53_s0, %s53_s0 }
  0x16   :  { %v29_v4 = vsub.s32 0, %v28_v3  ;;  %v33_v5 = vsub.s32 1, %v28_v3  ;;  %p87_p8 = scmp.ne.s32.totalorder %s53_s0, %s86_s24  ;;  %p92_p10 = scmp.lt.s32.totalorder %s86_s24, %s86_s24 }
  0x17   :  { %v41_v10 = vsub.s32 %v38_v6, %v28_v3 }
  0x18   :  { %v30_v8 = vrot.slane %v25_v7, %v29_v4  ;;  %v34_v9 = vrot.slane %v25_v7, %v33_v5  ;;  %p93_p11 = por %p92_p10, %p91_p9 }
  0x1a   :  { %v35_v11 = vcombine.low %v30_v8, %v34_v9  ;;  %p94_p12 = pnand %p93_p11, %p87_p8 }
  0x1c   :  { %v42_v13 = vrot.slane %v35_v11, %v41_v10 }
  0x1e   :  { %v44_v14 = vadd.f32 %v42_v13, %v24_v12 }
  0x20   :  { %45 = vst [vmem:[#allocation5] sm:$0xf] %v44_v14 }
  0x21   :  { %97 = shalt.err (!%p94_p12)
}
  0x22   :  { %s98_s26 = scalar_lea.hbm %s159_s2, 64 }
  0x23   :  { %p99_p13 = scmp.ne.s32.totalorder %s159_s2, %s98_s26  ;;  %p102_p0 = scmp.lt.u32.totalorder %s98_s26, %s159_s2 }
  0x25   :  { %p104_p1 = pnand %p102_p0, %p99_p13 }
  0x27   :  { %107 = shalt.err (!%p104_p1)
}
  0x28   :  { %55 = dma.vmem_to_hbm [thread:$0]  %s53_s0, 64, %s159_s2, [#allocation4]  }
  0x29   :  { %110 = dma.done.wait [#allocation4], 64  }
  0x2a   :  { %111 = vsyncadd [#allocation4], 4294967232 }
  0x2b   :  { %59 = vsyncpa [#allocation3], 1 }
  0x2c   :  { %60 = vsyncpa [#allocation4], 1 }

</bundles_post_ra>
